<compile_context>
chip_gen: v7x
topology: tpu7x:2x2x1
jax: 0.10.0
libtpu: 0.0.40
codegen_flags: <defaults>
</compile_context>

<pallas_src>
import functools
import math

import jax
import jax.numpy as jnp
from jax import lax
from jax.experimental import pallas as pl
from jax.experimental.pallas import tpu as pltpu


def _round_up(n, m):
    return ((n + m - 1) // m) * m


def _self_attention_kernel(x_ref, wq_ref, wk_ref, wv_ref, out_ref, attn_ref,
                           *, seq_len, scale):
    # One batch element per grid step; all operands are VMEM-resident tiles.
    x = x_ref[0]                                                        # (Sp, Hp), padded rows/cols are 0
    q = jnp.dot(x, wq_ref[...], preferred_element_type=jnp.float32)    # (Sp, Kp)
    k = jnp.dot(x, wk_ref[...], preferred_element_type=jnp.float32)    # (Sp, Kp)
    v = jnp.dot(x, wv_ref[...], preferred_element_type=jnp.float32)    # (Sp, Hp)

    # scores[i, j] = q_i . k_j / sqrt(key_size); contract last dims (no explicit transpose).
    scores = lax.dot_general(q, k, (((1,), (1,)), ((), ())),
                             preferred_element_type=jnp.float32) * scale

    # PyTorch nn.Softmax(1) normalizes over the *query* axis (axis 0 of the 2-D
    # per-batch matrix). Mask padded query rows so they do not pollute the
    # per-column normalization. (Padded key columns hit zero v rows -> harmless.)
    sp = scores.shape[0]
    row_ids = lax.broadcasted_iota(jnp.int32, (sp, sp), 0)
    scores = jnp.where(row_ids < seq_len, scores, jnp.float32(-1e30))

    m = jnp.max(scores, axis=0, keepdims=True)
    e = jnp.exp(scores - m)
    attn = e / jnp.sum(e, axis=0, keepdims=True)
    # TODO(synk): attention dropout (p=0.1) is identity at inference; training-mode RNG dropout not implemented.

    out = jnp.dot(attn, v, preferred_element_type=jnp.float32)         # (Sp, Hp)
    out_ref[0] = out.astype(out_ref.dtype)
    attn_ref[0] = attn.astype(attn_ref.dtype)


def prepare_weights(wq, wk, wv):
    """One-time weight prep: PyTorch (out, in) layout -> (in, out), lane-padded to 128.

    wq, wk: (key_size, hidden); wv: (hidden, hidden). Do this once at parameter
    setup time, NOT per forward call.
    """
    key_size, hidden = wq.shape
    hp = _round_up(hidden, 128)
    kp = _round_up(key_size, 128)
    wq_t = jnp.pad(wq.T, ((0, hp - hidden), (0, kp - key_size)))
    wk_t = jnp.pad(wk.T, ((0, hp - hidden), (0, kp - key_size)))
    wv_t = jnp.pad(wv.T, ((0, hp - hidden), (0, hp - hidden)))
    return wq_t, wk_t, wv_t


@functools.partial(jax.jit, static_argnames=("key_size", "hidden_size"))
def self_attention(x, wq_t, wk_t, wv_t, *, key_size, hidden_size):
    """x: (B, S, hidden_size); w*_t: weights from prepare_weights().

    Returns (output, attn) matching the PyTorch module's forward:
      output: (B, S, hidden_size), attn: (B, S, S).
    """
    B, S, H = x.shape
    assert H == hidden_size
    Hp, Kp = wq_t.shape
    Sp = _round_up(S, 8)

    x_p = jnp.pad(x, ((0, 0), (0, Sp - S), (0, Hp - H)))

    kernel = functools.partial(
        _self_attention_kernel,
        seq_len=S,
        scale=1.0 / math.sqrt(float(key_size)),
    )

    out_p, attn_p = pl.pallas_call(
        kernel,
        out_shape=(jax.ShapeDtypeStruct((B, Sp, Hp), x.dtype),
                   jax.ShapeDtypeStruct((B, Sp, Sp), jnp.float32)),
        grid_spec=pltpu.PrefetchScalarGridSpec(
            num_scalar_prefetch=0,
            grid=(B,),
            in_specs=[
                pl.BlockSpec((1, Sp, Hp), lambda b: (b, 0, 0)),   # x, one batch element
                pl.BlockSpec((Hp, Kp), lambda b: (0, 0)),          # Wq^T (resident)
                pl.BlockSpec((Hp, Kp), lambda b: (0, 0)),          # Wk^T (resident)
                pl.BlockSpec((Hp, Hp), lambda b: (0, 0)),          # Wv^T (resident)
            ],
            out_specs=[
                pl.BlockSpec((1, Sp, Hp), lambda b: (b, 0, 0)),    # output
                pl.BlockSpec((1, Sp, Sp), lambda b: (b, 0, 0)),    # attention matrix
            ],
        ),
        compiler_params=pltpu.CompilerParams(
            dimension_semantics=("parallel",),        # shard batch across TCs (v7x megacore)
            vmem_limit_bytes=32 * 1024 * 1024,        # fits v7x's 64 MiB physical VMEM
        ),
    )(x_p, wq_t, wk_t, wv_t)

    # Slice away the zero padding.
    return out_p[:, :S, :H], attn_p[:, :S, :S]


if __name__ == "__main__":
    key = jax.random.PRNGKey(0)
    kx, kq, kk, kv = jax.random.split(key, 4)

    # Small shapes consistent with the module: batch=2, seq=8, hidden=32, key_size=16.
    B, S, H, K = 2, 8, 32, 16
    x = jax.random.normal(kx, (B, S, H), dtype=jnp.float32)

    # Deterministic nn.Linear(bias=False)-style init: U(-1/sqrt(in), 1/sqrt(in)),
    # weights in PyTorch (out, in) layout.
    bound = 1.0 / math.sqrt(H)
    wq = jax.random.uniform(kq, (K, H), jnp.float32, -bound, bound)
    wk = jax.random.uniform(kk, (K, H), jnp.float32, -bound, bound)
    wv = jax.random.uniform(kv, (H, H), jnp.float32, -bound, bound)

    # One-time weight prep (transpose + lane padding) outside the call path.
    wq_t, wk_t, wv_t = prepare_weights(wq, wk, wv)

    out, attn = self_attention(x, wq_t, wk_t, wv_t, key_size=K, hidden_size=H)
    out = jax.block_until_ready(out)
    attn = jax.block_until_ready(attn)

    # Pure-JAX reference (dropout p=0.1 is identity at inference).
    q_r = x @ wq.T
    k_r = x @ wk.T
    v_r = x @ wv.T
    scores_r = jnp.einsum("bqd,bkd->bqk", q_r, k_r) / math.sqrt(float(K))
    attn_r = jax.nn.softmax(scores_r, axis=1)        # matches nn.Softmax(1)
    out_r = jnp.einsum("bqk,bkh->bqh", attn_r, v_r)

    assert out.shape == (B, S, H) and attn.shape == (B, S, S)
    assert jnp.allclose(attn, attn_r, atol=1e-5, rtol=1e-5)
    assert jnp.allclose(out, out_r, atol=1e-5, rtol=1e-5)

    print("KERNEL_OK")
</pallas_src>

<mosaic_0001>
module attributes {stable_mosaic.version = 11 : i64} {
  func.func @_self_attention_kernel(%arg0: i32, %arg1: memref<1x8x128xf32, #tpu.memory_space<vmem>>, %arg2: memref<128x128xf32, #tpu.memory_space<vmem>>, %arg3: memref<128x128xf32, #tpu.memory_space<vmem>>, %arg4: memref<128x128xf32, #tpu.memory_space<vmem>>, %arg5: memref<1x8x128xf32, #tpu.memory_space<vmem>>, %arg6: memref<1x8x8xf32, #tpu.memory_space<vmem>>) attributes {dimension_semantics = [#tpu.dimension_semantics<parallel>], iteration_bounds = array<i64: 2>, scalar_prefetch = 0 : i64, scratch_operands = 0 : i64, tpu.core_type = #tpu.core_type<tc>, window_params = [{transform_indices = @transform_0, window_bounds = array<i64: 1, 8, 128>}, {pipeline_mode = #tpu.pipeline_mode<synchronous>, transform_indices = @transform_1, window_bounds = array<i64: 128, 128>}, {pipeline_mode = #tpu.pipeline_mode<synchronous>, transform_indices = @transform_2, window_bounds = array<i64: 128, 128>}, {pipeline_mode = #tpu.pipeline_mode<synchronous>, transform_indices = @transform_3, window_bounds = array<i64: 128, 128>}, {transform_indices = @transform_4, window_bounds = array<i64: 1, 8, 128>}, {transform_indices = @transform_5, window_bounds = array<i64: 1, 8, 8>}]} {
    %c0 = arith.constant 0 : index
    %c0_0 = arith.constant 0 : index
    %c0_1 = arith.constant 0 : index
    %0 = vector.load %arg1[%c0, %c0_0, %c0_1] : memref<1x8x128xf32, #tpu.memory_space<vmem>>, vector<1x8x128xf32>
    %1 = vector.shape_cast %0 : vector<1x8x128xf32> to vector<8x128xf32>
    %c0_2 = arith.constant 0 : index
    %c0_3 = arith.constant 0 : index
    %2 = vector.load %arg2[%c0_2, %c0_3] : memref<128x128xf32, #tpu.memory_space<vmem>>, vector<128x128xf32>
    %cst = arith.constant dense<0.000000e+00> : vector<8x128xf32>
    %3 = tpu.matmul %1, %2, %cst {dimension_numbers = #tpu.dot_dimension_numbers<[1], [0], [0], [1], [0, 0, 1, 1], [], []>} : vector<8x128xf32>, vector<128x128xf32>, vector<8x128xf32> -> vector<8x128xf32>
    %c0_4 = arith.constant 0 : index
    %c0_5 = arith.constant 0 : index
    %4 = vector.load %arg3[%c0_4, %c0_5] : memref<128x128xf32, #tpu.memory_space<vmem>>, vector<128x128xf32>
    %cst_6 = arith.constant dense<0.000000e+00> : vector<8x128xf32>
    %5 = tpu.matmul %1, %4, %cst_6 {dimension_numbers = #tpu.dot_dimension_numbers<[1], [0], [0], [1], [0, 0, 1, 1], [], []>} : vector<8x128xf32>, vector<128x128xf32>, vector<8x128xf32> -> vector<8x128xf32>
    %c0_7 = arith.constant 0 : index
    %c0_8 = arith.constant 0 : index
    %6 = vector.load %arg4[%c0_7, %c0_8] : memref<128x128xf32, #tpu.memory_space<vmem>>, vector<128x128xf32>
    %cst_9 = arith.constant dense<0.000000e+00> : vector<8x128xf32>
    %7 = tpu.matmul %1, %6, %cst_9 {dimension_numbers = #tpu.dot_dimension_numbers<[1], [0], [0], [1], [0, 0, 1, 1], [], []>} : vector<8x128xf32>, vector<128x128xf32>, vector<8x128xf32> -> vector<8x128xf32>
    %cst_10 = arith.constant dense<0.000000e+00> : vector<8x8xf32>
    %8 = tpu.matmul %3, %5, %cst_10 {dimension_numbers = #tpu.dot_dimension_numbers<[1], [1], [0], [0], [0, 0, 1, 0], [], []>} : vector<8x128xf32>, vector<8x128xf32>, vector<8x8xf32> -> vector<8x8xf32>
    %cst_11 = arith.constant 2.500000e-01 : f32
    %9 = vector.broadcast %cst_11 : f32 to vector<8x8xf32>
    %10 = arith.mulf %8, %9 : vector<8x8xf32>
    %11 = tpu.iota {dimensions = array<i32: 0>} : vector<8x8xi32>
    %c8_i32 = arith.constant 8 : i32
    %12 = vector.broadcast %c8_i32 : i32 to vector<8x8xi32>
    %13 = arith.cmpi slt, %11, %12 : vector<8x8xi32>
    %cst_12 = arith.constant -1.000000e+30 : f32
    %14 = vector.broadcast %cst_12 : f32 to vector<8x8xf32>
    %15 = arith.select %13, %10, %14 : vector<8x8xi1>, vector<8x8xf32>
    %cst_13 = arith.constant dense<0xFF800000> : vector<8xf32>
    %16 = vector.multi_reduction <maximumf>, %15, %cst_13 [0] : vector<8x8xf32> to vector<8xf32>
    %17 = vector.shape_cast %16 : vector<8xf32> to vector<1x8xf32>
    %18 = vector.broadcast %17 : vector<1x8xf32> to vector<8x8xf32>
    %19 = arith.subf %15, %18 : vector<8x8xf32>
    %20 = math.exp %19 : vector<8x8xf32>
    %cst_14 = arith.constant dense<0.000000e+00> : vector<8xf32>
    %21 = vector.multi_reduction <add>, %20, %cst_14 [0] : vector<8x8xf32> to vector<8xf32>
    %22 = vector.shape_cast %21 : vector<8xf32> to vector<1x8xf32>
    %23 = vector.broadcast %22 : vector<1x8xf32> to vector<8x8xf32>
    %24 = arith.divf %20, %23 : vector<8x8xf32>
    %cst_15 = arith.constant dense<0.000000e+00> : vector<8x128xf32>
    %25 = tpu.matmul %24, %7, %cst_15 {dimension_numbers = #tpu.dot_dimension_numbers<[1], [0], [0], [1], [0, 0, 1, 1], [], []>} : vector<8x8xf32>, vector<8x128xf32>, vector<8x128xf32> -> vector<8x128xf32>
    %c0_16 = arith.constant 0 : index
    %c0_17 = arith.constant 0 : index
    %c0_18 = arith.constant 0 : index
    %26 = vector.load %arg5[%c0_16, %c0_17, %c0_18] : memref<1x8x128xf32, #tpu.memory_space<vmem>>, vector<1x8x128xf32>
    %27 = vector.shape_cast %26 : vector<1x8x128xf32> to vector<8x128xf32>
    %28 = vector.shape_cast %25 : vector<8x128xf32> to vector<1x8x128xf32>
    tpu.vector_store %arg5[%c0_16, %c0_17, %c0_18], %28 {strides = array<i32>} : memref<1x8x128xf32, #tpu.memory_space<vmem>>, vector<1x8x128xf32>,
    %c0_19 = arith.constant 0 : index
    %c0_20 = arith.constant 0 : index
    %c0_21 = arith.constant 0 : index
    %29 = vector.load %arg6[%c0_19, %c0_20, %c0_21] : memref<1x8x8xf32, #tpu.memory_space<vmem>>, vector<1x8x8xf32>
    %30 = vector.shape_cast %29 : vector<1x8x8xf32> to vector<8x8xf32>
    %31 = vector.shape_cast %24 : vector<8x8xf32> to vector<1x8x8xf32>
    tpu.vector_store %arg6[%c0_19, %c0_20, %c0_21], %31 {strides = array<i32>} : memref<1x8x8xf32, #tpu.memory_space<vmem>>, vector<1x8x8xf32>,
    return
  }
  func.func @transform_0(%arg0: i32) -> (i32, i32, i32) {
    %c0_i32 = arith.constant 0 : i32
    %c0_i32_0 = arith.constant 0 : i32
    %c0_i32_1 = arith.constant 0 : i32
    return %arg0, %c0_i32, %c0_i32_0 : i32, i32, i32
  }
  func.func @transform_1(%arg0: i32) -> (i32, i32) {
    %c0_i32 = arith.constant 0 : i32
    %c0_i32_0 = arith.constant 0 : i32
    %c0_i32_1 = arith.constant 0 : i32
    return %c0_i32, %c0_i32_0 : i32, i32
  }
  func.func @transform_2(%arg0: i32) -> (i32, i32) {
    %c0_i32 = arith.constant 0 : i32
    %c0_i32_0 = arith.constant 0 : i32
    %c0_i32_1 = arith.constant 0 : i32
    return %c0_i32, %c0_i32_0 : i32, i32
  }
  func.func @transform_3(%arg0: i32) -> (i32, i32) {
    %c0_i32 = arith.constant 0 : i32
    %c0_i32_0 = arith.constant 0 : i32
    %c0_i32_1 = arith.constant 0 : i32
    return %c0_i32, %c0_i32_0 : i32, i32
  }
  func.func @transform_4(%arg0: i32) -> (i32, i32, i32) {
    %c0_i32 = arith.constant 0 : i32
    %c0_i32_0 = arith.constant 0 : i32
    %c0_i32_1 = arith.constant 0 : i32
    return %arg0, %c0_i32, %c0_i32_0 : i32, i32, i32
  }
  func.func @transform_5(%arg0: i32) -> (i32, i32, i32) {
    %c0_i32 = arith.constant 0 : i32
    %c0_i32_0 = arith.constant 0 : i32
    %c0_i32_1 = arith.constant 0 : i32
    return %arg0, %c0_i32, %c0_i32_0 : i32, i32, i32
  }
}

</mosaic_0001>

<bundles_post_ra>
// kernel: self_attention.1
= control target key start
LH: loop header
LB: loop body
LE: loop exit
PB: predicated region body
PF: predicated region fallthrough
CT: control target
= control target key end

     0   :  { %11 = vsyncpa [#allocation3], 0  ;;  %s1716_s0 = inlined_call_operand.vmem [shape: f32[2,8,128], index: 0, kind: input, shape index: {}]   ;;  %s1717_s1 = inlined_call_operand.hbm [shape: f32[128,128], index: 1, kind: input, shape index: {}]   ;;  %s1718_s2 = inlined_call_operand.hbm [shape: f32[128,128], index: 2, kind: input, shape index: {}]   ;;  %s1719_s3 = inlined_call_operand.hbm [shape: f32[128,128], index: 3, kind: input, shape index: {}]   ;;  %s1720_s4 = inlined_call_operand.hbm [shape: f32[2,8,128], index: 4, kind: output, shape index: {0}]   ;;  %s1721_s5 = inlined_call_operand.hbm [shape: f32[2,8,8], index: 5, kind: output, shape index: {1}]  }
   0x1   :  { %12 = vsyncpa [#allocation6], 0 }
   0x2   :  { %13 = vsyncpa [#allocation4], 0 }
   0x3   :  { %15 = vsyncpa [#allocation4 + $0x1], 0 }
   0x4   :  { %16 = vsyncpa [#allocation10], 0 }
   0x5   :  { %18 = vsyncpa [#allocation10 + $0x1], 0  ;;  %s1432_s18 = smov 0   ;;  %s1434_s19 = smov 0  }
   0x6   :  { %s1436_s20 = smov 0   ;;  %s1438_s21 = smov 0  }
   0x7 LB: > { %s1453_s22 = sadd.s32 4294967295, %s1390_s21   ;;  %s858_s23 = sadd.s32 4294967294, %s1390_s21   ;;  %s1390_s21 = sphi %s1438_s21, %s1742_s21   ;;  %s1386_s20 = sphi %s1436_s20, %s1741_s20   ;;  %s1382_s19 = sphi %s1434_s19, %s1740_s19   ;;  %s1378_s18 = sphi %s1432_s18, %s1739_s18  }
   0x8   : > { %s1457_s24 = sadd.s32 1, %s1390_s21   ;;  %s120_s25 = sadd.s32 1, %s1386_s20 }
   0x9   : > { %s117_s26 = ssub.s32 %s1390_s21, %s1457_s24  ;;  %p130_p0 = scmp.ne.s32.totalorder %s1386_s20, %s1382_s19 }
   0xa   : > { %p118_p1 = scmp.eq.s32.totalorder %s117_s26, 0  ;;  %p131_p2 = scmp.eq.s32.totalorder %s1453_s22, 1 }
   0xb   : > { %p136_p3 = scmp.ne.s32.totalorder %s1382_s19, %s1378_s18  ;;  %p137_p4 = scmp.eq.s32.totalorder %s858_s23, 1 }
   0xc   : > { %s1468_s27 = scalar_select %p118_p1, %s1386_s20, %s120_s25  }
   0xd   : > { %p1470_p5 = por %p131_p2, %p130_p0  ;;  %p1474_p6 = por %p137_p4, %p136_p3 }
   0xe   : > { %1725 = sst [smem:[#allocation15_spill]] %s1468_s27  ;;  %p859_p7 = scmp.ge.s32.totalorder %s1390_s21, 1 }
   0xf   : > { %s1726_s28 = scalar_select %p1470_p5, 1, 0 }
  0x10   : > { %s1727_s29 = scalar_select %p1474_p6, 1, 0 }
  0x11   : > { %p170_p8 = scmp.lt.s32.totalorder %s1390_s21, 3  ;;  %p1722_p9 = scmp.eq.s32.totalorder %s1453_s22, 0 }
  0x12   : > { %s1392_s6 = smov [#allocation5]   ;;  %s1393_s9 = smov [#allocation2]  }
  0x13   : > { %p1481_p10 = pnand %p859_p7, %p170_p8  ;;  %s195_s7 = sshll.u32 %s1392_s6, 4  ;;  %s1487_s7 = int_to_ptr.vmem [resolvable:$true] %s195_s7 }
  0x14   : > { %s182_s10 = sshll.u32 %s1393_s9, 4  ;;  %s1394_s11 = smov [#allocation7]   ;;  %s1495_s10 = int_to_ptr.vmem [resolvable:$true] %s182_s10 }
  0x15   : > { %s1728_s30 = scalar_select %p1481_p10, 1, 0 }
  0x16   : > { %p1136_p11 = pneg %p1481_p10  ;;  %s1497_s12 = sshll.u32 %s1394_s11, 4  ;;  %s209_s12 = int_to_ptr.vmem [resolvable:$true] %s1497_s12 }
  0x17   : > { %s1204_s15 = scalar_lea.hbm %s1718_s2, 2048 }
  0x18   : > { %p1491_p12 = pnand %p1722_p9, %p1136_p11  ;;  %p1205_p13 = scmp.ne.s32.totalorder %s1718_s2, %s1204_s15 }
  0x19   : > { %p1211_p3 = scmp.lt.u32.totalorder %s1204_s15, %s1718_s2 }
  0x1a   : > { %p1507_p0 = pneg %p1491_p12 }
  0x1c   : > { %p1207_p1 = pnand %p1507_p0, %p1205_p13 }
  0x1e   : > { %p1208_p2 = pneg %p1207_p1 }
  0x20   : > { %p1213_p4 = pnand %p1211_p3, %p1208_p2 }
  0x22   : > { %1216 = shalt.err (!%p1213_p4)
}
  0x23   : > { %s1217_s6 = scalar_lea.vmem %s1487_s7, 2048  ;;  %p1225_p9 = scmp.lt.s32.totalorder %s1487_s7, %s1487_s7 }
  0x24   : > { %p1218_p7 = scmp.ne.s32.totalorder %s1487_s7, %s1217_s6  ;;  %p1226_p6 = scmp.lt.s32.totalorder %s1217_s6, %s1217_s6 }
  0x26   : > { %p1220_p8 = pnand %p1218_p7, %p1507_p0  ;;  %p1227_p13 = por %p1226_p6, %p1225_p9 }
  0x28   : > { %p1221_p11 = pneg %p1220_p8 }
  0x2a   : > { %p1228_p1 = pnand %p1227_p13, %p1221_p11 }
  0x2c   : > { %1231 = shalt.err (!%p1228_p1)
}
  0x2d   : > { %s1395_s9 = smov 128   ;;  %s1396_s11 = smov 8  }
  0x2e   : > { %1142 = dma.hbm_to_vmem [thread:$0]  (!%p1491_p12), %s1718_s2, 2048, %s1487_s7, [#allocation6], %s1395_s9, %s1395_s9, %s1396_s11  }
  0x2f   : > { %s1232_s17 = scalar_lea.hbm %s1717_s1, 2048 }
  0x30   : > { %p1233_p6 = scmp.ne.s32.totalorder %s1717_s1, %s1232_s17  ;;  %p1239_p3 = scmp.lt.u32.totalorder %s1232_s17, %s1717_s1 }
  0x32   : > { %p1235_p9 = pnand %p1233_p6, %p1507_p0 }
  0x34   : > { %p1236_p2 = pneg %p1235_p9 }
  0x36   : > { %p1241_p4 = pnand %p1239_p3, %p1236_p2 }
  0x38   : > { %1244 = shalt.err (!%p1241_p4)
}
  0x39   : > { %s1245_s7 = scalar_lea.vmem %s1495_s10, 2048  ;;  %p1253_p13 = scmp.lt.s32.totalorder %s1495_s10, %s1495_s10 }
  0x3a   : > { %p1246_p7 = scmp.ne.s32.totalorder %s1495_s10, %s1245_s7  ;;  %p1254_p1 = scmp.lt.s32.totalorder %s1245_s7, %s1245_s7 }
  0x3c   : > { %p1248_p8 = pnand %p1246_p7, %p1507_p0  ;;  %p1255_p6 = por %p1254_p1, %p1253_p13 }
  0x3e   : > { %p1249_p11 = pneg %p1248_p8 }
  0x40   : > { %p1256_p9 = pnand %p1255_p6, %p1249_p11 }
  0x42   : > { %1259 = shalt.err (!%p1256_p9)
}
  0x43   : > { %1139 = dma.hbm_to_vmem [thread:$0]  (!%p1491_p12), %s1717_s1, 2048, %s1495_s10, [#allocation3], %s1395_s9, %s1395_s9, %s1396_s11  }
  0x44   : > { %s1260_s16 = scalar_lea.hbm %s1719_s3, 2048 }
  0x45   : > { %p1261_p2 = scmp.ne.s32.totalorder %s1719_s3, %s1260_s16  ;;  %p1267_p7 = scmp.lt.u32.totalorder %s1260_s16, %s1719_s3 }
  0x47   : > { %p1263_p3 = pnand %p1261_p2, %p1507_p0 }
  0x49   : > { %p1264_p4 = pneg %p1263_p3 }
  0x4b   : > { %p1269_p8 = pnand %p1267_p7, %p1264_p4 }
  0x4d   : > { %1272 = shalt.err (!%p1269_p8)
}
  0x4e   : > { %s1273_s7 = scalar_lea.vmem %s209_s12, 2048  ;;  %p1281_p6 = scmp.lt.s32.totalorder %s209_s12, %s209_s12 }
  0x4f   : > { %p1274_p11 = scmp.ne.s32.totalorder %s209_s12, %s1273_s7  ;;  %p1282_p9 = scmp.lt.s32.totalorder %s1273_s7, %s1273_s7 }
  0x51   : > { %p1276_p13 = pnand %p1274_p11, %p1507_p0  ;;  %p1283_p5 = por %p1282_p9, %p1281_p6 }
  0x53   : > { %p1277_p1 = pneg %p1276_p13 }
  0x55   : > { %p1284_p10 = pnand %p1283_p5, %p1277_p1 }
  0x57   : > { %1287 = shalt.err (!%p1284_p10)
}
  0x58   : > { %1145 = dma.hbm_to_vmem [thread:$0]  (!%p1491_p12), %s1719_s3, 2048, %s209_s12, [#allocation6], %s1395_s9, %s1395_s9, %s1396_s11  }
  0x59   : > { %p1731_p2 = scmp.ne.s32.totalorder %s1728_s30, 0 }
  0x5a   : > { %p1732_p0 = scmp.eq.s32.totalorder (!%p1731_p2), %s1453_s22, 0 }
  0x5b   : > { %231 = sbr.rel (%p1731_p2) target bundleno = 845 (0x34d), region = 36 }
  0x62   : > { %1361 = dma.done.wait (%p1732_p0), [#allocation3], 2048   ;;  %p1733_p3 = pmov %p1732_p0 }
  0x63   : > { %p1734_p5 = pmov %p1732_p0 }
  0x64   : > { %1363 = vsyncadd (%p1733_p3), [#allocation3], 4294965248 }
  0x65   : > { %1365 = dma.done.wait (%p1734_p5), [#allocation6], 4096   ;;  %p1735_p10 = pmov %p1732_p0 }
  0x66   : > { %v1397_v0 = vmov 0.0|0.0   ;;  %vm1398_vm0 = vmmov 0   ;;  %v1399_v1 = vmov 0.0   ;;  %v362_v2 = vld [vmem:[#allocation5] sm:$0xff]  ;;  %v363_v3 = vld [vmem:[#allocation5 + $0x8] sm:$0xff]  ;;  %v364_v7 = vld [vmem:[#allocation5 + $0x10] sm:$0xff] }
  0x67   : > { %1367 = vsyncadd (%p1735_p10), [#allocation6], 4294963200  ;;  %1072 = vmatprep.subr.bf16.mxu1 %v1397_v0  ;;  %1048 = vmatprep.subr.bf16.mxu0 %v1397_v0  ;;  %v276_v4 = vld [vmem:[#allocation2] sm:$0xff]  ;;  %v1073_v5 = vpack.c.bf16 %v363_v3, %v362_v2  ;;  %v277_v6 = vld [vmem:[#allocation2 + $0x8] sm:$0xff]  ;;  %p271_p12 = scmp.lt.s32.totalorder %s1453_s22, 1  ;;  %vm609_vm1 = vcmask 64512  }
  0x68   : > { %1000 = vmatprep.mubr.msk.f32.mxu1 %vm1398_vm0, %v1399_v1  ;;  %965 = vmatprep.mubr.msk.f32.mxu0 %vm1398_vm0, %v1399_v1  ;;  %v365_v8 = vld [vmem:[#allocation5 + $0x18] sm:$0xff]  ;;  %v1049_v9 = vpack.c.bf16 %v277_v6, %v276_v4  ;;  %v278_v10 = vld [vmem:[#allocation2 + $0x10] sm:$0xff]  ;;  %v366_v14 = vld [vmem:[#allocation5 + $0x20] sm:$0xff]  ;;  %s1633_s11 = sand.u32 1, %s1382_s19   ;;  %s874_s15 = sshll.u32 %s1453_s22, 7 }
  0x69   : > { %v279_v11 = vld [vmem:[#allocation2 + $0x18] sm:$0xff]  ;;  %1074 = vmatpush3.bf16.msra.mxu1 %v1073_v5  ;;  %v1076_v12 = vpack.c.bf16 %v365_v8, %v364_v7  ;;  %v367_v15 = vld [vmem:[#allocation5 + $0x28] sm:$0xff]  ;;  %v280_v16 = vld [vmem:[#allocation2 + $0x20] sm:$0xff]  ;;  %s272_s30 = scalar_select %p271_p12, %s1453_s22, 1 }
  0x6a   : > { %1050 = vmatpush3.bf16.msra.mxu0 %v1049_v9  ;;  %1075 = vmatprep.subr.bf16.mxu1 %v1397_v0  ;;  %v1052_v13 = vpack.c.bf16 %v279_v11, %v278_v10  ;;  %v281_v17 = vld [vmem:[#allocation2 + $0x28] sm:$0xff]  ;;  %v1079_v18 = vpack.c.bf16 %v367_v15, %v366_v14  ;;  %v368_v20 = vld [vmem:[#allocation5 + $0x30] sm:$0xff]  ;;  %v369_v21 = vld [vmem:[#allocation5 + $0x38] sm:$0xff]  ;;  %s868_s13 = sshll.u32 %s1633_s11, 3  ;;  %s1646_s25 = scalar_lea.hbm %s1721_s5, %s874_s15 }
  0x6b   : > { %1051 = vmatprep.subr.bf16.mxu0 %v1397_v0  ;;  %v1055_v19 = vpack.c.bf16 %v281_v17, %v280_v16  ;;  %v282_v22 = vld [vmem:[#allocation2 + $0x30] sm:$0xff]  ;;  %v283_v23 = vld [vmem:[#allocation2 + $0x38] sm:$0xff]  ;;  %v1082_v24 = vpack.c.bf16 %v369_v21, %v368_v20  ;;  %v370_v26 = vld [vmem:[#allocation5 + $0x40] sm:$0xff]  ;;  %s870_s8 = sshll.u32 %s272_s30, 3  ;;  %s270_s14 = scalar_lea.vmem [#allocation9], %s868_s13 }
  0x6c   : > { %v1058_v25 = vpack.c.bf16 %v283_v23, %v282_v22  ;;  %v371_v27 = vld [vmem:[#allocation5 + $0x48] sm:$0xff]  ;;  %v284_v28 = vld [vmem:[#allocation2 + $0x40] sm:$0xff]  ;;  %v372_v32 = vld [vmem:[#allocation5 + $0x50] sm:$0xff]  ;;  %s274_s9 = scalar_lea.vmem %s1716_s0, %s870_s8  ;;  %s736_s26 = sshll.u32 %s270_s14, 4  ;;  %s737_s26 = int_to_ptr.vmem [resolvable:$true] %s736_s26 }
  0x6d   : > { %1077 = vmatpush3.bf16.msra.mxu1 %v1076_v12  ;;  %v285_v29 = vld [vmem:[#allocation2 + $0x48] sm:$0xff]  ;;  %v1085_v30 = vpack.c.bf16 %v371_v27, %v370_v26  ;;  %v373_v33 = vld [vmem:[#allocation5 + $0x58] sm:$0xff]  ;;  %v286_v34 = vld [vmem:[#allocation2 + $0x50] sm:$0xff]  ;;  %s710_s6 = scalar_lea.sflag [#allocation10], %s1633_s11  ;;  %s1288_s7 = scalar_lea.vmem %s737_s26, 128 }
  0x6e   : > { %1053 = vmatpush3.bf16.msra.mxu0 %v1052_v13  ;;  %1078 = vmatprep.subr.bf16.mxu1 %v1397_v0  ;;  %v1061_v31 = vpack.c.bf16 %v285_v29, %v284_v28  ;;  %v287_v35 = vld [vmem:[#allocation2 + $0x58] sm:$0xff]  ;;  %v1088_v36 = vpack.c.bf16 %v373_v33, %v372_v32  ;;  %v374_v38 = vld [vmem:[#allocation5 + $0x60] sm:$0xff]  ;;  %v375_v39 = vld [vmem:[#allocation5 + $0x68] sm:$0xff]  ;;  %p1289_p4 = scmp.ne.s32.totalorder %s737_s26, %s1288_s7  ;;  %p1736_p7 = scmp.ne.s32.totalorder %s1726_s28, 0 }
  0x6f   : > { %1054 = vmatprep.subr.bf16.mxu0 %v1397_v0  ;;  %v1064_v37 = vpack.c.bf16 %v287_v35, %v286_v34  ;;  %v288_v40 = vld [vmem:[#allocation2 + $0x60] sm:$0xff]  ;;  %v289_v41 = vld [vmem:[#allocation2 + $0x68] sm:$0xff]  ;;  %v1091_v42 = vpack.c.bf16 %v375_v39, %v374_v38  ;;  %v376_v44 = vld [vmem:[#allocation5 + $0x70] sm:$0xff]  ;;  %s1400_s10 = smov [#allocation9]  }
  0x70   : > { %v1067_v43 = vpack.c.bf16 %v289_v41, %v288_v40  ;;  %v377_v45 = vld [vmem:[#allocation5 + $0x78] sm:$0xff]  ;;  %v290_v46 = vld [vmem:[#allocation2 + $0x70] sm:$0xff]  ;;  %v275_v50 = vld [vmem:[%s274_s9] sm:$0xff]  ;;  %p1290_p8 = pnand %p1289_p4, %p1736_p7  ;;  %s1292_s27 = sshll.u32 %s1400_s10, 4  ;;  %s1293_s27 = int_to_ptr.vmem [resolvable:$false] %s1292_s27 }
  0x71   : > { %1080 = vmatpush3.bf16.msra.mxu1 %v1079_v18  ;;  %v291_v47 = vld [vmem:[#allocation2 + $0x78] sm:$0xff]  ;;  %v1094_v48 = vpack.c.bf16 %v377_v45, %v376_v44  ;;  %v448_v51 = vld [vmem:[#allocation7] sm:$0xff]  ;;  %v449_v52 = vld [vmem:[#allocation7 + $0x8] sm:$0xff]  ;;  %s1294_s30 = scalar_lea.vmem %s1293_s27, 256  ;;  %p1295_p13 = scmp.lt.s32.totalorder %s737_s26, %s1293_s27 }
  0x72   : > { %1056 = vmatpush3.bf16.msra.mxu0 %v1055_v19  ;;  %1081 = vmatprep.subr.bf16.mxu1 %v1397_v0  ;;  %v1070_v49 = vpack.c.bf16 %v291_v47, %v290_v46  ;;  %v450_v53 = vld [vmem:[#allocation7 + $0x10] sm:$0xff]  ;;  %v1097_v54 = vpack.c.bf16 %v449_v52, %v448_v51  ;;  %v451_v55 = vld [vmem:[#allocation7 + $0x18] sm:$0xff]  ;;  %v452_v57 = vld [vmem:[#allocation7 + $0x20] sm:$0xff]  ;;  %p1291_p11 = pneg %p1290_p8  ;;  %p1296_p1 = scmp.lt.s32.totalorder %s1294_s30, %s1288_s7 }
  0x73   : > { %1057 = vmatprep.subr.bf16.mxu0 %v1397_v0  ;;  %v1100_v56 = vpack.c.bf16 %v451_v55, %v450_v53  ;;  %v453_v58 = vld [vmem:[#allocation7 + $0x28] sm:$0xff]  ;;  %v454_v60 = vld [vmem:[#allocation7 + $0x30] sm:$0xff]  ;;  %v455_v61 = vld [vmem:[#allocation7 + $0x38] sm:$0xff] }
  0x74   : > { %v1103_v59 = vpack.c.bf16 %v453_v58, %v452_v57  ;;  %v1106_v62 = vpack.c.bf16 %v455_v61, %v454_v60  ;;  %v456_v63 = vld [vmem:[#allocation7 + $0x40] sm:$0xff]  ;;  %v457_v2 = vld [vmem:[#allocation7 + $0x48] sm:$0xff]  ;;  %v458_v4 = vld [vmem:[#allocation7 + $0x50] sm:$0xff]  ;;  %p1297_p6 = por %p1296_p1, %p1295_p13 }
  0x75   : > { %1083 = vmatpush3.bf16.msra.mxu1 %v1082_v24  ;;  %v1109_v3 = vpack.c.bf16 %v457_v2, %v456_v63  ;;  %v459_v5 = vld [vmem:[#allocation7 + $0x58] sm:$0xff]  ;;  %v460_v7 = vld [vmem:[#allocation7 + $0x60] sm:$0xff]  ;;  %v461_v8 = vld [vmem:[#allocation7 + $0x68] sm:$0xff] }
  0x76   : > { %1059 = vmatpush3.bf16.msra.mxu0 %v1058_v25  ;;  %1084 = vmatprep.subr.bf16.mxu1 %v1397_v0  ;;  %v1112_v6 = vpack.c.bf16 %v459_v5, %v458_v4  ;;  %v1115_v9 = vpack.c.bf16 %v461_v8, %v460_v7  ;;  %v462_v10 = vld [vmem:[#allocation7 + $0x70] sm:$0xff]  ;;  %v463_v11 = vld [vmem:[#allocation7 + $0x78] sm:$0xff]  ;;  %p1298_p9 = pnand %p1297_p6, %p1291_p11 }
  0x77   : > { %1060 = vmatprep.subr.bf16.mxu0 %v1397_v0  ;;  %v1118_v12 = vpack.c.bf16 %v463_v11, %v462_v10 }
  0x79   : > { %1086 = vmatpush3.bf16.msra.mxu1 %v1085_v30 }
  0x7a   : > { %1062 = vmatpush3.bf16.msra.mxu0 %v1061_v31  ;;  %1087 = vmatprep.subr.bf16.mxu1 %v1397_v0 }
  0x7b   : > { %1063 = vmatprep.subr.bf16.mxu0 %v1397_v0 }
  0x7d   : > { %1089 = vmatpush3.bf16.msra.mxu1 %v1088_v36 }
  0x7e   : > { %1065 = vmatpush3.bf16.msra.mxu0 %v1064_v37  ;;  %1090 = vmatprep.subr.bf16.mxu1 %v1397_v0 }
  0x7f   : > { %1066 = vmatprep.subr.bf16.mxu0 %v1397_v0 }
  0x81   : > { %1092 = vmatpush3.bf16.msra.mxu1 %v1091_v42 }
  0x82   : > { %1068 = vmatpush3.bf16.msra.mxu0 %v1067_v43  ;;  %1093 = vmatprep.subr.bf16.mxu1 %v1397_v0 }
  0x83   : > { %1069 = vmatprep.subr.bf16.mxu0 %v1397_v0 }
  0x85   : > { %1095 = vmatpush3.bf16.msra.mxu1 %v1094_v48 }
  0x86   : > { %1071 = vmatpush3.bf16.msra.mxu0 %v1070_v49  ;;  %1038 = vmatprep.subr.mxu1 %v1399_v1 }
  0x87   : > { %1096 = vmatprep.subr.bf16.mxu0 %v1397_v0 }
  0x88   : > { %1001 = vmatmul.mubr.f32.vlgmr.msra.gmra.mrb[0].mxu1 %v275_v50 }
  0x89   : > { %966 = vmatmul.mubr.f32.vlgmr.msra.gmra.mrb[0].mxu0 %v275_v50  ;;  %1040 = vmatprep.mubr.msk.f32.mxu1 %vm1398_vm0, %v1399_v1 }
  0x8a   : > { %1035 = vmatprep.mubr.msk.f32.mxu0 %vm1398_vm0, %v1399_v1  ;;  %1098 = vmatpush3.bf16.msra.mxu0 %v1097_v54 }
  0x8b   : > { %1099 = vmatprep.subr.bf16.mxu0 %v1397_v0 }
  0x8e   : > { %1101 = vmatpush3.bf16.msra.mxu0 %v1100_v56 }
  0x8f   : > { %1102 = vmatprep.subr.bf16.mxu0 %v1397_v0 }
  0x92   : > { %1104 = vmatpush3.bf16.msra.mxu0 %v1103_v59 }
  0x93   : > { %1105 = vmatprep.subr.bf16.mxu0 %v1397_v0 }
  0x96   : > { %1107 = vmatpush3.bf16.msra.mxu0 %v1106_v62 }
  0x97   : > { %1108 = vmatprep.subr.bf16.mxu0 %v1397_v0 }
  0x9a   : > { %1110 = vmatpush3.bf16.msra.mxu0 %v1109_v3 }
  0x9b   : > { %1111 = vmatprep.subr.bf16.mxu0 %v1397_v0 }
  0x9e   : > { %1113 = vmatpush3.bf16.msra.mxu0 %v1112_v6 }
  0x9f   : > { %1114 = vmatprep.subr.bf16.mxu0 %v1397_v0 }
  0xa2   : > { %1116 = vmatpush3.bf16.msra.mxu0 %v1115_v9 }
  0xa3   : > { %1117 = vmatprep.subr.bf16.mxu0 %v1397_v0 }
  0xa6   : > { %1119 = vmatpush3.bf16.msra.mxu0 %v1118_v12 }
  0xa9   : > { %1036 = vmatmul.mubr.f32.vlgmr.msra.gmra.mrb[2].mxu0 %v275_v50 }
 0x15b   : > { %v444_v13 = vpop.f32.mrb[0].mxu1 }
 0x15c   : > { %v1002_v14 = vpop.f32.mrb[1].mxu1  ;;  %1039 = vmatpush3.xpose.msra.mxu1 %v444_v13  ;;  %v358_v15 = vpop.f32.mrb[0].mxu0 }
 0x15d   : > { %v967_v16 = vpop.f32.mrb[1].mxu0  ;;  %1043 = vmatprep.subr.mxu1 %v1399_v1 }
 0x15f   : > { %1041 = vmatmul.mubr.f32.vlgmr.msra.gmra.mrb[2].mxu1 %v358_v15 }
 0x160   : > { %1045 = vmatprep.mubr.msk.f32.mxu1 %vm1398_vm0, %v1399_v1 }
 0x17c   : > { %v530_v17 = vpop.f32.mrb[2].mxu0 }
 0x17d   : > { %v1037_v18 = vpop.f32.mrb[3].mxu0  ;;  %1044 = vmatpush3.msra.mxu1 %v530_v17 }
 0x232   : > { %v600_v19 = vpop.f32.mrb[2].mxu1 }
 0x233   : > { %v604_v20 = vmul.f32 0.25, %v600_v19  ;;  %v1042_v0 = vpop.f32.mrb[3].mxu1 }
 0x235   : > { %v610_v21 = vsel %vm609_vm1, %v604_v20, -inf }
 0x236   : > { %v611_v22 = vrot.slane %v610_v21, 4 }
 0x238   : > { %v612_v23 = vmax.f32 %v610_v21, %v611_v22 }
 0x23a   : > { %v613_v24 = vrot.slane %v612_v23, 2 }
 0x23c   : > { %v614_v25 = vmax.f32 %v612_v23, %v613_v24 }
 0x23e   : > { %v615_v26 = vrot.slane %v614_v25, 1 }
 0x240   : > { %v616_v27 = vmax.f32 %v614_v25, %v615_v26 }
 0x242   : > { %v617_v28 = vsub.f32 %v604_v20, %v616_v27 }
 0x244   : > { %v618_v29 = vmul.f32 1.442695, %v617_v28 }
 0x246   : > { %1200 = vpow2.f32 %v618_v29 }
 0x250   : > { %v1201_v1 = vpop.eup %1200 }
 0x251   : > { %v620_v30 = vsel %vm609_vm1, %v1201_v1, 0.0 }
 0x252   : > { %v621_v31 = vrot.slane %v620_v30, 4 }
 0x254   : > { %v622_v32 = vadd.f32 %v621_v31, %v620_v30 }
 0x256   : > { %v623_v33 = vrot.slane %v622_v32, 2 }
 0x258   : > { %v624_v34 = vadd.f32 %v623_v33, %v622_v32 }
 0x25a   : > { %v625_v35 = vrot.slane %v624_v34, 1 }
 0x25c   : > { %v626_v36 = vadd.f32 %v625_v35, %v624_v34 }
 0x25e   : > { %1202 = vrcp.f32 %v626_v36 }
 0x268   : > { %v1203_v37 = vpop.eup %1202 }
 0x269   : > { %v628_v38 = vmul.f32 %v1203_v37, %v1201_v1 }
 0x26b   : > { %1046 = vmatmul.mubr.msk.f32.vlgmr.msra.gmra.mrb[4].mxu1 %vm609_vm1, %v628_v38  ;;  %703 = vst.msk [vmem:[%s270_s14] sm:$0xff] %vm609_vm1, %v628_v38 }
 0x26c   : > { %1301 = shalt.err (!%p1298_p9)
}
 0x26d   : > { %s1302_s8 = scalar_lea.hbm %s1646_s25, 128  ;;  %s1306_s9 = scalar_lea.hbm %s1721_s5, 256 }
 0x26e   : > { %p1303_p2 = scmp.ne.s32.totalorder %s1646_s25, %s1302_s8  ;;  %p1307_p5 = scmp.lt.u32.totalorder %s1646_s25, %s1721_s5 }
 0x26f   : > { %p1308_p10 = scmp.lt.u32.totalorder %s1306_s9, %s1302_s8  ;;  %p1310_p4 = scmp.lt.u32.totalorder %s1302_s8, %s1646_s25 }
 0x270   : > { %p1304_p0 = pnand %p1303_p2, %p1736_p7 }
 0x271   : > { %p1309_p12 = por %p1308_p10, %p1307_p5 }
 0x272   : > { %p1305_p3 = pneg %p1304_p0 }
 0x273   : > { %p1311_p8 = por %p1310_p4, %p1309_p12 }
 0x275   : > { %p1312_p11 = pnand %p1311_p8, %p1305_p3 }
 0x277   : > { %1315 = shalt.err (!%p1312_p11)
}
 0x278   : > { %1133 = dma.vmem_to_hbm [thread:$0]  (%p1736_p7), %s737_s26, 128, %s1646_s25, %s710_s6  }
 0x279   : > { %s263_s17 = scalar_lea.vmem [#allocation8], %s868_s13  ;;  %s1675_s30 = scalar_lea.hbm %s1720_s4, %s874_s15 }
 0x27a   : > { %s723_s7 = sshll.u32 %s263_s17, 4  ;;  %s705_s8 = scalar_lea.sflag [#allocation4], %s1633_s11  ;;  %s1668_s7 = int_to_ptr.vmem [resolvable:$true] %s723_s7 }
 0x27b   : > { %s1316_s12 = scalar_lea.vmem %s1668_s7, 128  ;;  %s1401_s13 = smov [#allocation8]  }
 0x27c   : > { %p1317_p13 = scmp.ne.s32.totalorder %s1668_s7, %s1316_s12  ;;  %s1320_s25 = sshll.u32 %s1401_s13, 4  ;;  %s1321_s25 = int_to_ptr.vmem [resolvable:$false] %s1320_s25 }
 0x27d   : > { %s1322_s22 = scalar_lea.vmem %s1321_s25, 256  ;;  %p1323_p9 = scmp.lt.s32.totalorder %s1668_s7, %s1321_s25 }
 0x27e   : > { %p1318_p1 = pnand %p1317_p13, %p1736_p7  ;;  %p1324_p2 = scmp.lt.s32.totalorder %s1322_s22, %s1316_s12 }
 0x280   : > { %p1319_p6 = pneg %p1318_p1  ;;  %p1325_p0 = por %p1324_p2, %p1323_p9 }
 0x282   : > { %p1326_p3 = pnand %p1325_p0, %p1319_p6 }
 0x33e   : > { %v698_v39 = vpop.f32.mrb[4].mxu1 }
 0x33f   : > { %702 = vst [vmem:[%s263_s17] sm:$0xff] %v698_v39  ;;  %v1047_v40 = vpop.f32.mrb[5].mxu1 }
 0x340   : > { %1329 = shalt.err (!%p1326_p3)
}
 0x341   : > { %s1330_s11 = scalar_lea.hbm %s1675_s30, 128  ;;  %s1334_s6 = scalar_lea.hbm %s1720_s4, 256 }
 0x342   : > { %p1331_p5 = scmp.ne.s32.totalorder %s1675_s30, %s1330_s11  ;;  %p1335_p4 = scmp.lt.u32.totalorder %s1675_s30, %s1720_s4 }
 0x343   : > { %p1336_p8 = scmp.lt.u32.totalorder %s1334_s6, %s1330_s11  ;;  %p1338_p13 = scmp.lt.u32.totalorder %s1330_s11, %s1675_s30 }
 0x344   : > { %p1332_p10 = pnand %p1331_p5, %p1736_p7 }
 0x345   : > { %p1337_p11 = por %p1336_p8, %p1335_p4 }
 0x346   : > { %p1333_p12 = pneg %p1332_p10 }
 0x347   : > { %p1339_p1 = por %p1338_p13, %p1337_p11 }
 0x349   : > { %p1340_p6 = pnand %p1339_p1, %p1333_p12 }
 0x34b   : > { %1343 = shalt.err (!%p1340_p6)
}
 0x34c   : > { %1132 = dma.vmem_to_hbm [thread:$0]  (%p1736_p7), %s1668_s7, 128, %s1675_s30, %s705_s8  }
 0x34d PF: > { %p1159_p9 = scmp.ge.s32.totalorder %s1390_s21, 2  ;;  %s748_s14 = sand.u32 1, %s1378_s18  }
 0x34e   : > { %p1737_p2 = scmp.ne.s32.totalorder %s1727_s29, 0  ;;  %s749_s16 = scalar_lea.sflag [#allocation4], %s748_s14 }
 0x350   : > { %p1147_p0 = pnand %p1159_p9, %p1737_p2 }
 0x352   : > { %1369 = dma.done.wait (!%p1147_p0), %s749_s16, 128  }
 0x353   : > { %1371 = vsyncadd (!%p1147_p0), %s749_s16, 4294967168  ;;  %s758_s17 = scalar_lea.sflag [#allocation10], %s748_s14 }
 0x354   : > { %1373 = dma.done.wait (!%p1147_p0), %s758_s17, 128  }
 0x355   : > { %1375 = vsyncadd (!%p1147_p0), %s758_s17, 4294967168  ;;  %s1738_s28 = sld [smem:[#allocation15_spill]]  ;;  %p21_p7 = scmp.ge.s32.totalorder %s1457_s24, 4  }
 0x356   : > { %s1739_s18 = smov %s1382_s19  ;;  %s1740_s19 = smov %s1386_s20 }
 0x357   : > { %s1742_s21 = smov %s1457_s24  ;;  %23 = sbr.rel (!%p21_p7) target bundleno = 7 (0x7), region = 101 }
 0x35b   : > { %s1741_s20 = smov %s1738_s28 }
 0x35e   :  { %763 = vsyncpa [#allocation3], 1 }
 0x35f   :  { %765 = vsyncpa [#allocation3 + $0x1], 1 }
 0x360   :  { %766 = vsyncpa [#allocation6], 1 }
 0x361   :  { %767 = vsyncpa [#allocation4], 1 }
 0x362   :  { %769 = vsyncpa [#allocation4 + $0x1], 1 }
 0x363   :  { %770 = vsyncpa [#allocation10], 1 }
 0x364   :  { %772 = vsyncpa [#allocation10 + $0x1], 1 }

</bundles_post_ra>
